<compile_context>
chip_gen: v5e
topology: v5e:2x2
jax: 0.10.0
libtpu: 0.0.40
codegen_flags: <defaults>
</compile_context>

<pallas_src>
import jax
import jax.numpy as jnp
from jax.experimental import pallas as pl
from jax.experimental.pallas import tpu as pltpu


def _round_up(n, m):
    return (n + m - 1) // m * m


def _qnet_kernel(x_ref, w1_ref, b1_ref, w2_ref, b2_ref, q_ref):
    # fc1 + tanh: MXU matmul (f32 accumulate) + EUP tanh in f32.
    x = x_ref[...]
    h = jnp.dot(x.astype(w1_ref.dtype), w1_ref[...],
                preferred_element_type=jnp.float32)
    h = jnp.tanh(h + b1_ref[...].astype(jnp.float32))   # (1,Hp) broadcasts to (TM,Hp)
    # fc2: second MXU matmul, f32 accumulate, bias add in f32, cast on store.
    q = jnp.dot(h.astype(w2_ref.dtype), w2_ref[...],
                preferred_element_type=jnp.float32)
    q_ref[...] = (q + b2_ref[...].astype(jnp.float32)).astype(q_ref.dtype)


def qnet_forward(x, w1, b1, w2, b2, *, block_b=256, weight_dtype=None):
    """x: [B, S], w1: [S, H], b1: [1, H], w2: [H, A], b2: [1, A] -> [B, A].

    block_b:      batch tile size (rounded to a multiple of 8 sublanes).
    weight_dtype: optional storage dtype for w1/w2 (e.g. jnp.bfloat16 on
                  v6e/v7x); accumulation and tanh stay f32.
    """
    B, S = x.shape
    H = w1.shape[1]
    A = w2.shape[1]
    out_dtype = x.dtype
    wd = w1.dtype if weight_dtype is None else weight_dtype

    # Lane-dense padding of hidden/action axes; sublane/tile padding of batch.
    Hp = _round_up(H, 128)
    Ap = _round_up(A, 128)
    TM = min(int(block_b), _round_up(B, 8))
    TM = _round_up(TM, 8)
    Bp = _round_up(B, TM)

    x_p = jnp.pad(x, ((0, Bp - B), (0, 0)))
    w1_p = jnp.pad(w1, ((0, 0), (0, Hp - H))).astype(wd)
    b1_p = jnp.pad(b1.reshape(1, H), ((0, 0), (0, Hp - H))).astype(jnp.float32)
    w2_p = jnp.pad(w2, ((0, Hp - H), (0, Ap - A))).astype(wd)
    b2_p = jnp.pad(b2.reshape(1, A), ((0, 0), (0, Ap - A))).astype(jnp.float32)

    grid = (Bp // TM,)
    itemsize = lambda a: a.size * a.dtype.itemsize
    cost = pl.CostEstimate(
        flops=2 * Bp * (S * Hp + Hp * Ap),
        transcendentals=Bp * Hp,
        bytes_accessed=(itemsize(x_p) + itemsize(w1_p) + itemsize(b1_p)
                        + itemsize(w2_p) + itemsize(b2_p)
                        + Bp * Ap * jnp.dtype(out_dtype).itemsize),
    )

    q_p = pl.pallas_call(
        _qnet_kernel,
        out_shape=jax.ShapeDtypeStruct((Bp, Ap), out_dtype),
        grid=grid,
        in_specs=[
            pl.BlockSpec((TM, S), lambda i: (i, 0)),    # batch-tiled activations
            pl.BlockSpec((S, Hp), lambda i: (0, 0)),    # weights stay VMEM-resident
            pl.BlockSpec((1, Hp), lambda i: (0, 0)),
            pl.BlockSpec((Hp, Ap), lambda i: (0, 0)),
            pl.BlockSpec((1, Ap), lambda i: (0, 0)),
        ],
        out_specs=pl.BlockSpec((TM, Ap), lambda i: (i, 0)),
        compiler_params=pltpu.CompilerParams(
            dimension_semantics=("parallel",),
            vmem_limit_bytes=32 * 1024 * 1024,
        ),
        cost_estimate=cost,
    )(x_p, w1_p, b1_p, w2_p, b2_p)

    return q_p[:B, :A]


def init_params(key, state_size, hidden_size, action_size, dtype=jnp.float32):
    """Deterministic init matching nn.Linear's default uniform(-1/sqrt(fan_in), +)."""
    k1, k2, k3, k4 = jax.random.split(key, 4)
    bound1 = 1.0 / jnp.sqrt(state_size)
    bound2 = 1.0 / jnp.sqrt(hidden_size)
    w1 = jax.random.uniform(k1, (state_size, hidden_size), dtype, -bound1, bound1)
    b1 = jax.random.uniform(k2, (1, hidden_size), dtype, -bound1, bound1)
    w2 = jax.random.uniform(k3, (hidden_size, action_size), dtype, -bound2, bound2)
    b2 = jax.random.uniform(k4, (1, action_size), dtype, -bound2, bound2)
    return w1, b1, w2, b2


if __name__ == "__main__":
    # Small shapes consistent with a DRL Q-network forward pass.
    batch, state_size, hidden_size, action_size = 8, 16, 32, 4

    key = jax.random.PRNGKey(0)
    kx, kp, kb = jax.random.split(key, 3)
    x = jax.random.normal(kx, (batch, state_size), jnp.float32)
    w1, b1, w2, b2 = init_params(kp, state_size, hidden_size, action_size)

    # Small-batch call (single grid step).
    q = qnet_forward(x, w1, b1, w2, b2)
    jax.block_until_ready(q)

    h_ref = jnp.tanh(x @ w1 + b1)
    q_ref = h_ref @ w2 + b2
    assert q.shape == (batch, action_size)
    assert jnp.allclose(q, q_ref, atol=1e-5, rtol=1e-5)

    # Replay-buffer-sized batch exercising the multi-tile grid path (batch not
    # a multiple of the tile, so the padding/slicing path is also checked).
    big_b = 260
    xb = jax.random.normal(kb, (big_b, state_size), jnp.float32)
    qb = qnet_forward(xb, w1, b1, w2, b2, block_b=128)
    jax.block_until_ready(qb)
    qb_ref = jnp.tanh(xb @ w1 + b1) @ w2 + b2
    assert qb.shape == (big_b, action_size)
    assert jnp.allclose(qb, qb_ref, atol=1e-5, rtol=1e-5)

    print("KERNEL_OK")
</pallas_src>

<mosaic_0001>
module attributes {stable_mosaic.version = 11 : i64} {
  func.func @_qnet_kernel(%arg0: i32, %arg1: memref<8x16xf32, #tpu.memory_space<vmem>>, %arg2: memref<16x128xf32, #tpu.memory_space<vmem>>, %arg3: memref<1x128xf32, #tpu.memory_space<vmem>>, %arg4: memref<128x128xf32, #tpu.memory_space<vmem>>, %arg5: memref<1x128xf32, #tpu.memory_space<vmem>>, %arg6: memref<8x128xf32, #tpu.memory_space<vmem>>) attributes {dimension_semantics = [#tpu.dimension_semantics<parallel>], iteration_bounds = array<i64: 1>, scalar_prefetch = 0 : i64, scratch_operands = 0 : i64, tpu.core_type = #tpu.core_type<tc>, window_params = [{transform_indices = @transform_0, window_bounds = array<i64: 8, 16>}, {pipeline_mode = #tpu.pipeline_mode<synchronous>, transform_indices = @transform_1, window_bounds = array<i64: 16, 128>}, {pipeline_mode = #tpu.pipeline_mode<synchronous>, transform_indices = @transform_2, window_bounds = array<i64: 1, 128>}, {pipeline_mode = #tpu.pipeline_mode<synchronous>, transform_indices = @transform_3, window_bounds = array<i64: 128, 128>}, {pipeline_mode = #tpu.pipeline_mode<synchronous>, transform_indices = @transform_4, window_bounds = array<i64: 1, 128>}, {transform_indices = @transform_5, window_bounds = array<i64: 8, 128>}]} {
    %c0 = arith.constant 0 : index
    %c0_0 = arith.constant 0 : index
    %0 = vector.load %arg1[%c0, %c0_0] : memref<8x16xf32, #tpu.memory_space<vmem>>, vector<8x16xf32>
    %c0_1 = arith.constant 0 : index
    %c0_2 = arith.constant 0 : index
    %1 = vector.load %arg2[%c0_1, %c0_2] : memref<16x128xf32, #tpu.memory_space<vmem>>, vector<16x128xf32>
    %cst = arith.constant dense<0.000000e+00> : vector<8x128xf32>
    %2 = tpu.matmul %0, %1, %cst {dimension_numbers = #tpu.dot_dimension_numbers<[1], [0], [0], [1], [0, 0, 1, 1], [], []>} : vector<8x16xf32>, vector<16x128xf32>, vector<8x128xf32> -> vector<8x128xf32>
    %c0_3 = arith.constant 0 : index
    %c0_4 = arith.constant 0 : index
    %3 = vector.load %arg3[%c0_3, %c0_4] : memref<1x128xf32, #tpu.memory_space<vmem>>, vector<1x128xf32>
    %4 = vector.broadcast %3 : vector<1x128xf32> to vector<8x128xf32>
    %5 = arith.addf %2, %4 : vector<8x128xf32>
    %6 = math.tanh %5 : vector<8x128xf32>
    %c0_5 = arith.constant 0 : index
    %c0_6 = arith.constant 0 : index
    %7 = vector.load %arg4[%c0_5, %c0_6] : memref<128x128xf32, #tpu.memory_space<vmem>>, vector<128x128xf32>
    %cst_7 = arith.constant dense<0.000000e+00> : vector<8x128xf32>
    %8 = tpu.matmul %6, %7, %cst_7 {dimension_numbers = #tpu.dot_dimension_numbers<[1], [0], [0], [1], [0, 0, 1, 1], [], []>} : vector<8x128xf32>, vector<128x128xf32>, vector<8x128xf32> -> vector<8x128xf32>
    %c0_8 = arith.constant 0 : index
    %c0_9 = arith.constant 0 : index
    %9 = vector.load %arg5[%c0_8, %c0_9] : memref<1x128xf32, #tpu.memory_space<vmem>>, vector<1x128xf32>
    %10 = vector.broadcast %9 : vector<1x128xf32> to vector<8x128xf32>
    %11 = arith.addf %8, %10 : vector<8x128xf32>
    %c0_10 = arith.constant 0 : index
    %c0_11 = arith.constant 0 : index
    %12 = vector.load %arg6[%c0_10, %c0_11] : memref<8x128xf32, #tpu.memory_space<vmem>>, vector<8x128xf32>
    tpu.vector_store %arg6[%c0_10, %c0_11], %11 {strides = array<i32>} : memref<8x128xf32, #tpu.memory_space<vmem>>, vector<8x128xf32>,
    return
  }
  func.func @transform_0(%arg0: i32) -> (i32, i32) {
    %c0_i32 = arith.constant 0 : i32
    %c0_i32_0 = arith.constant 0 : i32
    return %arg0, %c0_i32 : i32, i32
  }
  func.func @transform_1(%arg0: i32) -> (i32, i32) {
    %c0_i32 = arith.constant 0 : i32
    %c0_i32_0 = arith.constant 0 : i32
    %c0_i32_1 = arith.constant 0 : i32
    return %c0_i32, %c0_i32_0 : i32, i32
  }
  func.func @transform_2(%arg0: i32) -> (i32, i32) {
    %c0_i32 = arith.constant 0 : i32
    %c0_i32_0 = arith.constant 0 : i32
    %c0_i32_1 = arith.constant 0 : i32
    return %c0_i32, %c0_i32_0 : i32, i32
  }
  func.func @transform_3(%arg0: i32) -> (i32, i32) {
    %c0_i32 = arith.constant 0 : i32
    %c0_i32_0 = arith.constant 0 : i32
    %c0_i32_1 = arith.constant 0 : i32
    return %c0_i32, %c0_i32_0 : i32, i32
  }
  func.func @transform_4(%arg0: i32) -> (i32, i32) {
    %c0_i32 = arith.constant 0 : i32
    %c0_i32_0 = arith.constant 0 : i32
    %c0_i32_1 = arith.constant 0 : i32
    return %c0_i32, %c0_i32_0 : i32, i32
  }
  func.func @transform_5(%arg0: i32) -> (i32, i32) {
    %c0_i32 = arith.constant 0 : i32
    %c0_i32_0 = arith.constant 0 : i32
    return %arg0, %c0_i32 : i32, i32
  }
}

</mosaic_0001>

<bundles_post_ra>
// kernel: tpu_custom_call.1
= control target key start
LH: loop header
LB: loop body
LE: loop exit
PB: predicated region body
PF: predicated region fallthrough
CT: control target
= control target key end

     0   :  { %10 = vsyncpa [#allocation3], 0  ;;  %s324_s0 = inlined_call_operand.hbm [shape: f32[8,16], index: 0, kind: input, shape index: {}]   ;;  %s325_s1 = inlined_call_operand.hbm [shape: f32[16,128], index: 1, kind: input, shape index: {}]   ;;  %s326_s2 = inlined_call_operand.vmem [shape: f32[1,128], index: 2, kind: input, shape index: {}]   ;;  %s327_s3 = inlined_call_operand.hbm [shape: f32[128,128], index: 3, kind: input, shape index: {}]   ;;  %s328_s4 = inlined_call_operand.vmem [shape: f32[1,128], index: 4, kind: input, shape index: {}]   ;;  %s329_s5 = inlined_call_operand.hbm [shape: f32[8,128], index: 5, kind: output, shape index: {}]  }
   0x1   :  { %11 = vsyncpa [#allocation6], 0  ;;  %s28_s20 = sshll.u32 %s325_s1, 4  ;;  %s29_s20 = int_to_ptr.hbm [resolvable:$true] %s28_s20 }
   0x2   :  { %12 = vsyncpa [#allocation4], 0  ;;  %s270_s21 = smov [#allocation5]   ;;  %s18_s25 = sshll.u32 %s324_s0, 4  ;;  %s19_s25 = int_to_ptr.hbm [resolvable:$true] %s18_s25 }
   0x3   :  { %s30_s22 = sshll.u32 %s270_s21, 4  ;;  %s271_s26 = smov 128   ;;  %s31_s22 = int_to_ptr.vmem [resolvable:$true] %s30_s22 }
   0x4   :  { %s272_s27 = smov 8   ;;  %s273_s28 = smov [#allocation2]  }
   0x5   :  { %36 = dma.hbm_to_vmem [thread:$0]  %s29_s20, 256, %s31_s22, [#allocation6], %s271_s26, %s271_s26, %s272_s27  }
   0x6   :  { %s20_s29 = sshll.u32 %s273_s28, 4  ;;  %s43_s7 = sshll.u32 %s327_s3, 4  ;;  %s21_s29 = int_to_ptr.vmem [resolvable:$true] %s20_s29  ;;  %s44_s7 = int_to_ptr.hbm [resolvable:$true] %s43_s7 }
   0x7   :  { %23 = dma.hbm_to_vmem [thread:$0]  %s19_s25, 128, %s21_s29, [#allocation3]  }
   0x8   :  { %s274_s1 = smov [#allocation7]  }
   0x9   :  { %s45_s8 = sshll.u32 %s274_s1, 4  ;;  %s46_s8 = int_to_ptr.vmem [resolvable:$true] %s45_s8 }
   0xa   :  { %51 = dma.hbm_to_vmem [thread:$0]  %s44_s7, 2048, %s46_s8, [#allocation6], %s271_s26, %s271_s26, %s272_s27  }
   0xb   :  { %264 = dma.done.wait [#allocation3], 128  }
   0xc   :  { %265 = vsyncadd [#allocation3], 4294967168 }
   0xd   :  { %266 = dma.done.wait [#allocation6], 2304  }
   0xe   :  { %267 = vsyncadd [#allocation6], 4294964992  ;;  %v68_v0 = vld [vmem:[#allocation5 + $0x8] sm:$0xff]  ;;  %v67_v1 = vld [vmem:[#allocation5] sm:$0xff]  ;;  %vm73_vm0 = vcmask 130048   ;;  %s275_s11 = smov [#allocation8]  }
   0xf   :  { %91 = vmatpush.msra.mxu0 %v68_v0  ;;  %v66_v2 = vld [vmem:[#allocation2] sm:$0xff]  ;;  %v113_v3 = vld [vmem:[#allocation7 + $0x78] sm:$0xff]  ;;  %v112_v4 = vld [vmem:[#allocation7 + $0x70] sm:$0xff]  ;;  %s144_s12 = sshll.u32 %s275_s11, 4  ;;  %s146_s15 = sshll.u32 %s329_s5, 4  ;;  %s145_s12 = int_to_ptr.vmem [resolvable:$true] %s144_s12  ;;  %s147_s15 = int_to_ptr.hbm [resolvable:$true] %s146_s15 }
  0x10   :  { %118 = vmatpush.msra.mxu1 %v113_v3  ;;  %v111_v5 = vld [vmem:[#allocation7 + $0x68] sm:$0xff]  ;;  %v110_v6 = vld [vmem:[#allocation7 + $0x60] sm:$0xff]  ;;  %v109_v7 = vld [vmem:[#allocation7 + $0x58] sm:$0xff] }
  0x11   :  { %92 = vmatpush.msra.mxu0 %v67_v1  ;;  %v108_v8 = vld [vmem:[#allocation7 + $0x50] sm:$0xff]  ;;  %v107_v9 = vld [vmem:[#allocation7 + $0x48] sm:$0xff]  ;;  %v106_v10 = vld [vmem:[#allocation7 + $0x40] sm:$0xff] }
  0x12   :  { %157 = vmatmul.msk.f32.vlgmr.msra.gmra.mxu0 %vm73_vm0, %v66_v2  ;;  %119 = vmatpush.msra.mxu1 %v112_v4  ;;  %v105_v11 = vld [vmem:[#allocation7 + $0x38] sm:$0xff]  ;;  %v104_v12 = vld [vmem:[#allocation7 + $0x30] sm:$0xff]  ;;  %v103_v13 = vld [vmem:[#allocation7 + $0x28] sm:$0xff] }
  0x13   :  { %v102_v14 = vld [vmem:[#allocation7 + $0x20] sm:$0xff]  ;;  %v101_v15 = vld [vmem:[#allocation7 + $0x18] sm:$0xff]  ;;  %v100_v16 = vld [vmem:[#allocation7 + $0x10] sm:$0xff] }
  0x14   :  { %120 = vmatpush.msra.mxu1 %v111_v5  ;;  %v99_v17 = vld [vmem:[#allocation7 + $0x8] sm:$0xff]  ;;  %v98_v18 = vld [vmem:[#allocation7] sm:$0xff] }
  0x15   :  { %v164_v19 = vld [vmem:[%s326_s2] ss:$0 sm:$0xff] }
  0x16   :  { %121 = vmatpush.msra.mxu1 %v110_v6  ;;  %v165_v23 = vld [vmem:[%s328_s4] ss:$0 sm:$0xff] }
  0x18   :  { %122 = vmatpush.msra.mxu1 %v109_v7 }
  0x1a   :  { %123 = vmatpush.msra.mxu1 %v108_v8 }
  0x1c   :  { %124 = vmatpush.msra.mxu1 %v107_v9 }
  0x1e   :  { %125 = vmatpush.msra.mxu1 %v106_v10 }
  0x20   :  { %126 = vmatpush.msra.mxu1 %v105_v11 }
  0x22   :  { %127 = vmatpush.msra.mxu1 %v104_v12 }
  0x24   :  { %128 = vmatpush.msra.mxu1 %v103_v13 }
  0x26   :  { %129 = vmatpush.msra.mxu1 %v102_v14 }
  0x28   :  { %130 = vmatpush.msra.mxu1 %v101_v15 }
  0x2a   :  { %131 = vmatpush.msra.mxu1 %v100_v16 }
  0x2c   :  { %132 = vmatpush.msra.mxu1 %v99_v17 }
  0x2e   :  { %133 = vmatpush.msra.mxu1 %v98_v18 }
  0x8f   :  { %v94_v20 = vpop.f32.mrf.mxu0 }
  0x90   :  { %v95_v21 = vadd.f32 %v164_v19, %v94_v20 }
  0x92   :  { %166 = vtanh.f32 %v95_v21 }
  0x98   :  { %v167_v22 = vpop.eup %166 }
  0x99   :  { %134 = vmatmul.f32.vlgmr.msra.gmra.mxu1 %v167_v22 }
 0x116   :  { %v135_v24 = vpop.f32.mrf.mxu1 }
 0x117   :  { %v136_v25 = vadd.f32 %v165_v23, %v135_v24 }
 0x119   :  { %138 = vst [vmem:[#allocation8] sm:$0xff] %v136_v25 }
 0x11a   :  { %149 = dma.vmem_to_hbm [thread:$0]  %s145_s12, 128, %s147_s15, [#allocation4]  }
 0x11b   :  { %268 = dma.done.wait [#allocation4], 128  }
 0x11c   :  { %269 = vsyncadd [#allocation4], 4294967168 }
 0x11d   :  { %154 = vsyncpa [#allocation3], 1 }
 0x11e   :  { %155 = vsyncpa [#allocation6], 1 }
 0x11f   :  { %156 = vsyncpa [#allocation4], 1 }

</bundles_post_ra>
